<compile_context>
chip_gen: v5e
topology: v5e:2x2
jax: 0.10.0
libtpu: 0.0.40
codegen_flags: <defaults>
</compile_context>

<pallas_src>
import functools

import jax
import jax.numpy as jnp
import numpy as np
from jax import lax
from jax.experimental import pallas as pl
from jax.experimental.pallas import tpu as pltpu

EPS_NORM = 1e-5    # block RMSNorm eps (norm_epsilon)
EPS_GATED = 1e-5   # Mamba2 RMSNormGated eps


def _pick_block(dim, candidates):
    """Largest candidate tile that evenly divides `dim`, else the full dim."""
    for c in candidates:
        if c <= dim and dim % c == 0:
            return c
    return dim


# -------------------- kernel 1: fused residual add + RMSNorm (prenorm) ------
def _rmsnorm_prenorm_kernel(x_ref, w_ref, hs_ref, res_ref, *, eps):
    res = x_ref[...].astype(jnp.float32)
    var = jnp.mean(res * res, axis=-1, keepdims=True)
    hs_ref[...] = (res * lax.rsqrt(var + eps) * w_ref[...]).astype(hs_ref.dtype)
    res_ref[...] = res


def _add_rmsnorm_prenorm_kernel(x_ref, r_ref, w_ref, hs_ref, res_ref, *, eps):
    res = x_ref[...].astype(jnp.float32) + r_ref[...].astype(jnp.float32)
    var = jnp.mean(res * res, axis=-1, keepdims=True)
    hs_ref[...] = (res * lax.rsqrt(var + eps) * w_ref[...]).astype(hs_ref.dtype)
    res_ref[...] = res


def fused_add_rmsnorm(x2d, residual2d, norm_w, *, eps=EPS_NORM,
                      hs_dtype=jnp.bfloat16):
    """Returns (hs, residual): hs = RMSNorm(x (+residual)) * w, residual fp32."""
    M, D = x2d.shape
    tm = _pick_block(M, (1024, 512, 256, 128, 64, 32, 16, 8))
    grid = (M // tm,)
    x_spec = pl.BlockSpec((tm, D), lambda i: (i, 0))
    w_spec = pl.BlockSpec((1, D), lambda i: (0, 0))
    out_specs = (pl.BlockSpec((tm, D), lambda i: (i, 0)),
                 pl.BlockSpec((tm, D), lambda i: (i, 0)))
    out_shape = (jax.ShapeDtypeStruct((M, D), hs_dtype),
                 jax.ShapeDtypeStruct((M, D), jnp.float32))
    cparams = pltpu.CompilerParams(dimension_semantics=("parallel",))
    if residual2d is None:
        kernel = functools.partial(_rmsnorm_prenorm_kernel, eps=eps)
        return pl.pallas_call(
            kernel, grid=grid, in_specs=[x_spec, w_spec],
            out_specs=out_specs, out_shape=out_shape, compiler_params=cparams,
        )(x2d, norm_w)
    kernel = functools.partial(_add_rmsnorm_prenorm_kernel, eps=eps)
    return pl.pallas_call(
        kernel, grid=grid, in_specs=[x_spec, x_spec, w_spec],
        out_specs=out_specs, out_shape=out_shape, compiler_params=cparams,
    )(x2d, residual2d, norm_w)


# -------------------- kernel 2: tiled dense (MXU matmul) ---------------------
def _matmul_kernel(a_ref, b_ref, o_ref, acc_ref):
    @pl.when(pl.program_id(2) == 0)
    def _():
        acc_ref[...] = jnp.zeros_like(acc_ref)

    acc_ref[...] += jnp.dot(a_ref[...], b_ref[...],
                            preferred_element_type=jnp.float32)

    @pl.when(pl.program_id(2) == pl.num_programs(2) - 1)
    def _():
        o_ref[...] = acc_ref[...].astype(o_ref.dtype)


def dense(x2d, w2d, *, out_dtype=jnp.float32):
    """x2d: (M,K) bf16, w2d: (K,N) bf16 -> (M,N) out_dtype, f32 accumulation."""
    M, K = x2d.shape
    _, N = w2d.shape
    tm = _pick_block(M, (256, 128, 64, 32, 16, 8))
    tn = _pick_block(N, (256, 128))
    tk = _pick_block(K, (512, 256, 128))
    return pl.pallas_call(
        _matmul_kernel,
        grid=(M // tm, N // tn, K // tk),
        in_specs=[pl.BlockSpec((tm, tk), lambda i, j, k: (i, k)),
                  pl.BlockSpec((tk, tn), lambda i, j, k: (k, j))],
        out_specs=pl.BlockSpec((tm, tn), lambda i, j, k: (i, j)),
        out_shape=jax.ShapeDtypeStruct((M, N), out_dtype),
        scratch_shapes=[pltpu.VMEM((tm, tn), jnp.float32)],
        compiler_params=pltpu.CompilerParams(
            dimension_semantics=("parallel", "parallel", "arbitrary")),
    )(x2d, w2d)


# -------------------- kernel 3: causal depthwise conv1d + SiLU + split -------
def _conv_silu_split_kernel(x_ref, w_ref, b_ref, xo_ref, bo_ref, co_ref,
                            win_ref, halo_ref, *, K, d_inner, d_state):
    lt = pl.program_id(1)

    @pl.when(lt == 0)
    def _():
        halo_ref[...] = jnp.zeros_like(halo_ref)   # causal left padding

    x = x_ref[0].astype(jnp.float32)               # (Lt, C)
    Lt = x.shape[0]

    # assemble the causal window: [previous K-1 raw rows | current raw rows]
    win_ref[0:K - 1, :] = halo_ref[...]
    win_ref[K - 1:, :] = x

    wv = w_ref[...].astype(jnp.float32)            # (K, C)
    acc = jnp.broadcast_to(b_ref[...].astype(jnp.float32), x.shape)
    for k in range(K):                             # K is tiny (d_conv=4)
        acc = acc + win_ref[k:k + Lt, :] * wv[k:k + 1, :]
    y = acc * jax.nn.sigmoid(acc)                  # SiLU

    xo_ref[0] = y[:, :d_inner].astype(xo_ref.dtype)
    bo_ref[0] = y[:, d_inner:d_inner + d_state].astype(bo_ref.dtype)
    co_ref[0] = y[:, d_inner + d_state:].astype(co_ref.dtype)

    # carry the last K-1 raw input rows for the next sequence tile
    halo_ref[...] = x[Lt - (K - 1):, :]


def causal_conv_silu_split(xBC, conv_w, conv_b, d_inner, d_state, *,
                           seq_block=512):
    B, L, C = xBC.shape
    K = conv_w.shape[0]
    Lt = seq_block if (seq_block <= L and L % seq_block == 0) else L
    if Lt < K - 1:
        Lt = L
    nlt = L // Lt
    kernel = functools.partial(_conv_silu_split_kernel,
                               K=K, d_inner=d_inner, d_state=d_state)
    return pl.pallas_call(
        kernel,
        grid=(B, nlt),
        in_specs=[pl.BlockSpec((1, Lt, C), lambda b, l: (b, l, 0)),
                  pl.BlockSpec((K, C), lambda b, l: (0, 0)),
                  pl.BlockSpec((1, C), lambda b, l: (0, 0))],
        out_specs=(pl.BlockSpec((1, Lt, d_inner), lambda b, l: (b, l, 0)),
                   pl.BlockSpec((1, Lt, d_state), lambda b, l: (b, l, 0)),
                   pl.BlockSpec((1, Lt, d_state), lambda b, l: (b, l, 0))),
        out_shape=(jax.ShapeDtypeStruct((B, L, d_inner), jnp.float32),
                   jax.ShapeDtypeStruct((B, L, d_state), jnp.float32),
                   jax.ShapeDtypeStruct((B, L, d_state), jnp.float32)),
        scratch_shapes=[pltpu.VMEM((Lt + K - 1, C), jnp.float32),
                        pltpu.VMEM((K - 1, C), jnp.float32)],
        compiler_params=pltpu.CompilerParams(
            dimension_semantics=("parallel", "arbitrary")),
    )(xBC, conv_w, conv_b)


# -------------------- kernel 4: chunked SSD scan + fused RMSNormGated --------
def _ssd_gated_norm_kernel(x_ref, b_ref, c_ref, dt_ref, z_ref, a_ref, dtb_ref,
                           dexp_ref, w_ref, o_ref, state_ref, ybuf_ref,
                           *, H, P, N, eps):
    cidx = pl.program_id(1)

    @pl.when(cidx == 0)
    def _():
        state_ref[...] = jnp.zeros_like(state_ref)

    x = x_ref[0].astype(jnp.float32)       # (Lc, H*P)
    Bm = b_ref[0].astype(jnp.float32)      # (Lc, N)
    Cm = c_ref[0].astype(jnp.float32)      # (Lc, N)
    dt = dt_ref[0].astype(jnp.float32)     # (Lc, H)
    Lc = x.shape[0]

    # vectorized dt prologue for all heads at once (heads on lanes)
    dt_p = jax.nn.softplus(dt + dtb_ref[...])          # (Lc, H)
    a_seg = dt_p * a_ref[...]                          # (Lc, H), negative

    t_ids = lax.broadcasted_iota(jnp.int32, (Lc, Lc), 0)
    s_ids = lax.broadcasted_iota(jnp.int32, (Lc, Lc), 1)
    causal = s_ids <= t_ids
    tril = causal.astype(jnp.float32)
    # inclusive cumulative sum of per-step log-decays via one MXU matmul
    cuml = jnp.dot(tril, a_seg, preferred_element_type=jnp.float32,
                   precision=lax.Precision.HIGHEST)    # (Lc, H)
    cuml_t = cuml.T                                    # (H, Lc)

    # C_t . B_s Gram matrix, shared by all heads (ngroups == 1)
    G = jnp.dot(Cm, Bm.T, preferred_element_type=jnp.float32,
                precision=lax.Precision.HIGHEST)       # (Lc, Lc)
    neg = jnp.float32(-1e30)

    for h in range(H):      # static unroll; each iteration is MXU matmuls
        cl_col = cuml[:, h:h + 1]                        # (Lc, 1)
        cl_row = cuml_t[h:h + 1, :]                      # (1, Lc)
        xdt = x[:, h * P:(h + 1) * P] * dt_p[:, h:h + 1]  # (Lc, P)

        # intra-chunk: y[t] += sum_{s<=t} (C_t.B_s) exp(cum[t]-cum[s]) dt_s x_s
        decay = jnp.exp(jnp.where(causal, cl_col - cl_row, neg))
        y_h = jnp.dot(G * decay, xdt, preferred_element_type=jnp.float32,
                      precision=lax.Precision.HIGHEST)   # (Lc, P)

        # inter-chunk: y[t] += exp(cum[t]) * C_t @ S0
        S0 = state_ref[h]                                # (N, P)
        y_h = y_h + jnp.exp(cl_col) * jnp.dot(
            Cm, S0, preferred_element_type=jnp.float32,
            precision=lax.Precision.HIGHEST)

        # carried state: S_new = exp(cum[Lc]) S0 + sum_s exp(cum[Lc]-cum[s]) dt_s B_s x_s^T
        cl_end = cl_col[Lc - 1:Lc, :]                    # (1, 1)
        w_s = jnp.exp(cl_end - cl_col)                   # (Lc, 1)
        state_ref[h] = jnp.exp(cl_end) * S0 + jnp.dot(
            (Bm * w_s).T, xdt, preferred_element_type=jnp.float32,
            precision=lax.Precision.HIGHEST)             # (N, P)

        ybuf_ref[:, h * P:(h + 1) * P] = y_h

    y = ybuf_ref[...] + x * dexp_ref[...]                # + D * x (all heads)

    # fused RMSNormGated (norm_before_gate=False): g = y * silu(z)
    z = z_ref[0].astype(jnp.float32)
    g = y * (z * jax.nn.sigmoid(z))
    var = jnp.mean(g * g, axis=-1, keepdims=True)
    o_ref[0] = (g * lax.rsqrt(var + eps) * w_ref[...]).astype(o_ref.dtype)


def ssd_scan_gated_norm(xs, Bm, Cm, dt, z, A, dt_bias, D_expand, ssm_norm_w, *,
                        chunk_size=128, eps=EPS_GATED, out_dtype=jnp.bfloat16):
    B, L, d_inner = xs.shape
    N = Bm.shape[-1]
    H = dt.shape[-1]
    P = d_inner // H
    Lc = chunk_size if (chunk_size <= L and L % chunk_size == 0) else L
    nc = L // Lc
    kernel = functools.partial(_ssd_gated_norm_kernel, H=H, P=P, N=N, eps=eps)
    return pl.pallas_call(
        kernel,
        grid=(B, nc),
        in_specs=[
            pl.BlockSpec((1, Lc, d_inner), lambda b, c: (b, c, 0)),
            pl.BlockSpec((1, Lc, N), lambda b, c: (b, c, 0)),
            pl.BlockSpec((1, Lc, N), lambda b, c: (b, c, 0)),
            pl.BlockSpec((1, Lc, H), lambda b, c: (b, c, 0)),
            pl.BlockSpec((1, Lc, d_inner), lambda b, c: (b, c, 0)),
            pl.BlockSpec((1, H), lambda b, c: (0, 0)),
            pl.BlockSpec((1, H), lambda b, c: (0, 0)),
            pl.BlockSpec((1, d_inner), lambda b, c: (0, 0)),
            pl.BlockSpec((1, d_inner), lambda b, c: (0, 0)),
        ],
        out_specs=pl.BlockSpec((1, Lc, d_inner), lambda b, c: (b, c, 0)),
        out_shape=jax.ShapeDtypeStruct((B, L, d_inner), out_dtype),
        scratch_shapes=[pltpu.VMEM((H, N, P), jnp.float32),
                        pltpu.VMEM((Lc, d_inner), jnp.float32)],
        compiler_params=pltpu.CompilerParams(
            dimension_semantics=("parallel", "arbitrary")),
    )(xs, Bm, Cm, dt, z, A, dt_bias, D_expand, ssm_norm_w)


# -------------------- parameter preparation (done once, outside forward) -----
def prepare_params(raw, *, d_model, d_inner, d_state, d_conv, nheads, headdim):
    conv_dim = d_inner + 2 * d_state
    Win = raw["in_proj_w"]                    # (d_in_proj, d_model), torch layout
    return {
        "norm_w": raw["norm_w"].reshape(1, d_model).astype(jnp.float32),
        # pre-split + pre-transposed + bf16 projection weights
        "w_z": Win[:d_inner, :].T.astype(jnp.bfloat16),
        "w_xbc": Win[d_inner:d_inner + conv_dim, :].T.astype(jnp.bfloat16),
        "w_dt": Win[d_inner + conv_dim:, :].T.astype(jnp.bfloat16),
        "w_out": raw["out_proj_w"].T.astype(jnp.bfloat16),
        "conv_w": raw["conv_w"].astype(jnp.float32),              # (K, conv_dim)
        "conv_b": raw["conv_b"].reshape(1, conv_dim).astype(jnp.float32),
        "A": (-jnp.exp(raw["A_log"].astype(jnp.float32))).reshape(1, nheads),
        "dt_bias": raw["dt_bias"].reshape(1, nheads).astype(jnp.float32),
        "D_expand": jnp.repeat(raw["D"].astype(jnp.float32),
                               headdim).reshape(1, d_inner),
        "ssm_norm_w": raw["ssm_norm_w"].reshape(1, d_inner).astype(jnp.float32),
    }


# -------------------- full block forward (Pallas kernels + thin glue) --------
def genomix_mamba2_block_forward(p, hidden_states, residual=None, *,
                                 d_inner, headdim, d_state, d_conv, nheads,
                                 scan_chunk=128, conv_seq_block=512):
    B, L, D = hidden_states.shape
    M = B * L
    conv_dim = d_inner + 2 * d_state

    x2 = hidden_states.reshape(M, D)
    r2 = None if residual is None else residual.reshape(M, D)
    hs2, res2 = fused_add_rmsnorm(x2, r2, p["norm_w"])      # hs bf16, res fp32

    # in_proj split into three tiled matmuls (weights pre-split / pre-transposed)
    z = dense(hs2, p["w_z"]).reshape(B, L, d_inner)
    xbc = dense(hs2, p["w_xbc"]).reshape(B, L, conv_dim)
    dt = dense(hs2, p["w_dt"]).reshape(B, L, nheads)

    xs, Bm, Cm = causal_conv_silu_split(xbc, p["conv_w"], p["conv_b"],
                                        d_inner, d_state,
                                        seq_block=conv_seq_block)

    y = ssd_scan_gated_norm(xs, Bm, Cm, dt, z, p["A"], p["dt_bias"],
                            p["D_expand"], p["ssm_norm_w"],
                            chunk_size=scan_chunk)          # (B,L,d_inner) bf16

    out = dense(y.reshape(M, d_inner), p["w_out"]).reshape(B, L, D)
    return out, res2.reshape(B, L, D)


# -------------------- pure-JAX reference (sequential scan) -------------------
def reference_forward(p, hidden_states, residual, *,
                      d_inner, headdim, d_state, d_conv, nheads):
    x32 = hidden_states.astype(jnp.float32)
    res = x32 if residual is None else x32 + residual.astype(jnp.float32)
    var = jnp.mean(res * res, -1, keepdims=True)
    hs = res * lax.rsqrt(var + EPS_NORM) * p["norm_w"]
    hs_b = hs.astype(jnp.bfloat16)

    z = jnp.dot(hs_b, p["w_z"], preferred_element_type=jnp.float32)
    xbc = jnp.dot(hs_b, p["w_xbc"], preferred_element_type=jnp.float32)
    dt = jnp.dot(hs_b, p["w_dt"], preferred_element_type=jnp.float32)

    B, L, _ = hs.shape
    K = p["conv_w"].shape[0]
    conv_dim = d_inner + 2 * d_state
    xp = jnp.pad(xbc, ((0, 0), (K - 1, 0), (0, 0)))
    acc = jnp.zeros((B, L, conv_dim), jnp.float32) + p["conv_b"]
    for k in range(K):
        acc = acc + xp[:, k:k + L, :] * p["conv_w"][k][None, None, :]
    xbc_c = acc * jax.nn.sigmoid(acc)
    xs = xbc_c[..., :d_inner]
    Bm = xbc_c[..., d_inner:d_inner + d_state]
    Cm = xbc_c[..., d_inner + d_state:]

    H, P, N = nheads, headdim, d_state
    dt_p = jax.nn.softplus(dt + p["dt_bias"])               # (B,L,H)
    da = jnp.exp(dt_p * p["A"])                             # (B,L,H)
    xh = xs.reshape(B, L, H, P)
    state = jnp.zeros((B, H, N, P), jnp.float32)
    ys = []
    for t in range(L):
        state = state * da[:, t, :, None, None] + (
            dt_p[:, t, :, None, None] * Bm[:, t, None, :, None]
            * xh[:, t, :, None, :])
        y_t = jnp.einsum('bhnp,bn->bhp', state, Cm[:, t])
        ys.append(y_t)
    y = jnp.stack(ys, axis=1).reshape(B, L, H * P) + xs * p["D_expand"]

    g = y * (z * jax.nn.sigmoid(z))
    var2 = jnp.mean(g * g, -1, keepdims=True)
    yn = g * lax.rsqrt(var2 + EPS_GATED) * p["ssm_norm_w"]
    out = jnp.dot(yn.astype(jnp.bfloat16), p["w_out"],
                  preferred_element_type=jnp.float32)
    return out, res


# -------------------- deterministic parameter init ---------------------------
def init_params(key, d_model, d_inner, d_state, d_conv, nheads, d_in_proj):
    conv_dim = d_inner + 2 * d_state
    ks = jax.random.split(key, 6)
    return {
        "norm_w": jnp.ones((d_model,), jnp.float32),
        "in_proj_w": 0.05 * jax.random.normal(ks[0], (d_in_proj, d_model), jnp.float32),
        "conv_w": 0.2 * jax.random.normal(ks[1], (d_conv, conv_dim), jnp.float32),
        "conv_b": 0.1 * jax.random.normal(ks[2], (conv_dim,), jnp.float32),
        "A_log": jnp.log(jnp.linspace(1.0, 4.0, nheads, dtype=jnp.float32)),
        "D": jnp.ones((nheads,), jnp.float32),
        "dt_bias": jax.random.uniform(ks[3], (nheads,), jnp.float32, -1.0, 1.0),
        "ssm_norm_w": jnp.ones((d_inner,), jnp.float32),
        "out_proj_w": 0.05 * jax.random.normal(ks[4], (d_model, d_inner), jnp.float32),
    }


if __name__ == "__main__":
    # small shapes consistent with the module
    B, L, d_model = 2, 16, 32
    expand, headdim, d_state, d_conv, ngroups = 2, 16, 16, 4, 1
    d_inner = expand * d_model                 # 64
    nheads = d_inner // headdim                # 4
    d_in_proj = 2 * d_inner + 2 * ngroups * d_state + nheads   # 164

    key = jax.random.PRNGKey(0)
    k_x, k_p = jax.random.split(key)
    hidden_states = jax.random.normal(k_x, (B, L, d_model), jnp.float32)
    raw = init_params(k_p, d_model, d_inner, d_state, d_conv, nheads, d_in_proj)
    params = prepare_params(raw, d_model=d_model, d_inner=d_inner,
                            d_state=d_state, d_conv=d_conv,
                            nheads=nheads, headdim=headdim)

    # small seq tiles / chunks so the halo carry and inter-chunk state carry
    # are actually exercised (L=16 -> 2 conv tiles, 2 SSD chunks)
    out, res = genomix_mamba2_block_forward(
        params, hidden_states, residual=None,
        d_inner=d_inner, headdim=headdim, d_state=d_state,
        d_conv=d_conv, nheads=nheads, scan_chunk=8, conv_seq_block=8)
    out, res = jax.block_until_ready((out, res))

    out_ref, res_ref = reference_forward(
        params, hidden_states, None,
        d_inner=d_inner, headdim=headdim, d_state=d_state,
        d_conv=d_conv, nheads=nheads)

    np.testing.assert_allclose(np.asarray(out), np.asarray(out_ref),
                               rtol=1e-2, atol=1e-2)
    np.testing.assert_allclose(np.asarray(res), np.asarray(res_ref),
                               rtol=1e-2, atol=1e-2)

    print("KERNEL_OK")
</pallas_src>

<mosaic_0001>
module attributes {stable_mosaic.version = 11 : i64} {
  func.func @_rmsnorm_prenorm_kernel(%arg0: i32, %arg1: memref<32x32xf32, #tpu.memory_space<vmem>>, %arg2: memref<1x32xf32, #tpu.memory_space<vmem>>, %arg3: memref<32x32xbf16, #tpu.memory_space<vmem>>, %arg4: memref<32x32xf32, #tpu.memory_space<vmem>>) attributes {dimension_semantics = [#tpu.dimension_semantics<parallel>], iteration_bounds = array<i64: 1>, scalar_prefetch = 0 : i64, scratch_operands = 0 : i64, tpu.core_type = #tpu.core_type<tc>, window_params = [{transform_indices = @transform_0, window_bounds = array<i64: 32, 32>}, {pipeline_mode = #tpu.pipeline_mode<synchronous>, transform_indices = @transform_1, window_bounds = array<i64: 1, 32>}, {transform_indices = @transform_2, window_bounds = array<i64: 32, 32>}, {transform_indices = @transform_3, window_bounds = array<i64: 32, 32>}]} {
    %c0 = arith.constant 0 : index
    %c0_0 = arith.constant 0 : index
    %0 = vector.load %arg1[%c0, %c0_0] : memref<32x32xf32, #tpu.memory_space<vmem>>, vector<32x32xf32>
    %1 = arith.mulf %0, %0 : vector<32x32xf32>
    %cst = arith.constant dense<0.000000e+00> : vector<32xf32>
    %2 = vector.multi_reduction <add>, %1, %cst [1] : vector<32x32xf32> to vector<32xf32>
    %3 = vector.shape_cast %2 : vector<32xf32> to vector<32x1xf32>
    %cst_1 = arith.constant 3.200000e+01 : f32
    %4 = vector.broadcast %cst_1 : f32 to vector<32x1xf32>
    %5 = arith.divf %3, %4 : vector<32x1xf32>
    %cst_2 = arith.constant 9.99999974E-6 : f32
    %6 = vector.broadcast %cst_2 : f32 to vector<32x1xf32>
    %7 = arith.addf %5, %6 : vector<32x1xf32>
    %8 = math.rsqrt %7 : vector<32x1xf32>
    %9 = vector.broadcast %8 : vector<32x1xf32> to vector<32x32xf32>
    %10 = arith.mulf %0, %9 : vector<32x32xf32>
    %c0_3 = arith.constant 0 : index
    %c0_4 = arith.constant 0 : index
    %11 = vector.load %arg2[%c0_3, %c0_4] : memref<1x32xf32, #tpu.memory_space<vmem>>, vector<1x32xf32>
    %12 = vector.broadcast %11 : vector<1x32xf32> to vector<32x32xf32>
    %13 = arith.mulf %10, %12 : vector<32x32xf32>
    %14 = arith.truncf %13 : vector<32x32xf32> to vector<32x32xbf16>
    %c0_5 = arith.constant 0 : index
    %c0_6 = arith.constant 0 : index
    %15 = vector.load %arg3[%c0_5, %c0_6] : memref<32x32xbf16, #tpu.memory_space<vmem>>, vector<32x32xbf16>
    tpu.vector_store %arg3[%c0_5, %c0_6], %14 {strides = array<i32>} : memref<32x32xbf16, #tpu.memory_space<vmem>>, vector<32x32xbf16>,
    %c0_7 = arith.constant 0 : index
    %c0_8 = arith.constant 0 : index
    %16 = vector.load %arg4[%c0_7, %c0_8] : memref<32x32xf32, #tpu.memory_space<vmem>>, vector<32x32xf32>
    tpu.vector_store %arg4[%c0_7, %c0_8], %0 {strides = array<i32>} : memref<32x32xf32, #tpu.memory_space<vmem>>, vector<32x32xf32>,
    return
  }
  func.func @transform_0(%arg0: i32) -> (i32, i32) {
    %c0_i32 = arith.constant 0 : i32
    %c0_i32_0 = arith.constant 0 : i32
    return %arg0, %c0_i32 : i32, i32
  }
  func.func @transform_1(%arg0: i32) -> (i32, i32) {
    %c0_i32 = arith.constant 0 : i32
    %c0_i32_0 = arith.constant 0 : i32
    %c0_i32_1 = arith.constant 0 : i32
    return %c0_i32, %c0_i32_0 : i32, i32
  }
  func.func @transform_2(%arg0: i32) -> (i32, i32) {
    %c0_i32 = arith.constant 0 : i32
    %c0_i32_0 = arith.constant 0 : i32
    return %arg0, %c0_i32 : i32, i32
  }
  func.func @transform_3(%arg0: i32) -> (i32, i32) {
    %c0_i32 = arith.constant 0 : i32
    %c0_i32_0 = arith.constant 0 : i32
    return %arg0, %c0_i32 : i32, i32
  }
}

</mosaic_0001>

<bundles_post_ra>
// kernel: tpu_custom_call.1
= control target key start
LH: loop header
LB: loop body
LE: loop exit
PB: predicated region body
PF: predicated region fallthrough
CT: control target
= control target key end

     0   :  { %9 = vsyncpa [#allocation3], 0  ;;  %s391_s0 = inlined_call_operand.hbm [shape: f32[32,32], index: 0, kind: input, shape index: {}]   ;;  %s392_s1 = inlined_call_operand.hbm [shape: f32[1,32], index: 1, kind: input, shape index: {}]   ;;  %s393_s2 = inlined_call_operand.hbm [shape: bf16[32,32], index: 2, kind: output, shape index: {0}]   ;;  %s394_s3 = inlined_call_operand.hbm [shape: f32[32,32], index: 3, kind: output, shape index: {1}]  }
   0x1   :  { %10 = vsyncpa [#allocation6], 0 }
   0x2   :  { %11 = vsyncpa [#allocation4], 0 }
   0x3   :  { %12 = vsyncpa [#allocation9], 0  ;;  %s17_s14 = sshll.u32 %s391_s0, 4  ;;  %s308_s15 = smov [#allocation2]   ;;  %s18_s14 = int_to_ptr.hbm [resolvable:$true] %s17_s14 }
   0x4   :  { %s19_s16 = sshll.u32 %s308_s15, 4  ;;  %s31_s19 = sshll.u32 %s392_s1, 4  ;;  %s20_s16 = int_to_ptr.vmem [resolvable:$true] %s19_s16  ;;  %s32_s19 = int_to_ptr.hbm [resolvable:$true] %s31_s19 }
   0x5   :  { %s309_s20 = smov 128   ;;  %s310_s21 = smov 8  }
   0x6   :  { %25 = dma.hbm_to_vmem [thread:$0]  %s18_s14, 512, %s20_s16, [#allocation3], %s309_s20, %s309_s20, %s310_s21  }
   0x7   :  { %s311_s22 = smov [#allocation5]  }
   0x8   :  { %s33_s23 = sshll.u32 %s311_s22, 4  ;;  %s34_s23 = int_to_ptr.vmem [resolvable:$true] %s33_s23 }
   0x9   :  { %36 = dma.hbm_to_vmem [thread:$0]  %s32_s19, 16, %s34_s23, [#allocation6]  }
   0xa   :  { %300 = dma.done.wait [#allocation3], 512  }
   0xb   :  { %301 = vsyncadd [#allocation3], 4294966784 }
   0xc   :  { %302 = dma.done.wait [#allocation6], 16  }
   0xd   :  { %303 = vsyncadd [#allocation6], 4294967280  ;;  %v346_v0 = vld [vmem:[#allocation2 + $0x10] sm:$0xff]  ;;  %vm53_vm0 = vcmask 261120   ;;  %v348_v1 = vld [vmem:[#allocation2] sm:$0xff]  ;;  %s312_s0 = smov [#allocation8]  }
   0xe   :  { %v51_v2 = vmul.f32 %v346_v0, %v346_v0  ;;  %144 = vst.msk [vmem:[#allocation8 + $0x10] sm:$0xff] %vm53_vm0, %v346_v0  ;;  %v49_v3 = vmul.f32 %v348_v1, %v348_v1  ;;  %v358_v4 = vld [vmem:[#allocation2 + $0x18] sm:$0xff]  ;;  %v360_v5 = vld [vmem:[#allocation2 + $0x8] sm:$0xff]  ;;  %s163_s1 = sshll.u32 %s312_s0, 4  ;;  %s165_s26 = sshll.u32 %s394_s3, 4  ;;  %v313_v12 = vmov 32.0   ;;  %s164_s1 = int_to_ptr.vmem [resolvable:$true] %s163_s1  ;;  %s166_s26 = int_to_ptr.hbm [resolvable:$true] %s165_s26 }
   0xf   :  { %142 = vst.msk [vmem:[#allocation8] sm:$0xff] %vm53_vm0, %v348_v1  ;;  %v52_v8 = vmul.f32 %v358_v4, %v358_v4  ;;  %v50_v9 = vmul.f32 %v360_v5, %v360_v5  ;;  %194 = vrcp.f32 %v313_v12  ;;  %v193_v45 = vld [vmem:[#allocation5] ss:$0 sm:$0xff]  ;;  %vm137_vm8 = vcmask 257024   ;;  %s314_s3 = smov [#allocation7]   ;;  %s152_s30 = sshll.u32 %s393_s2, 4  ;;  %s153_s30 = int_to_ptr.hbm [resolvable:$true] %s152_s30 }
  0x10   :  { %v60_v6 = vsel %vm53_vm0, %v51_v2, 0.0  ;;  %v54_v7 = vsel %vm53_vm0, %v49_v3, 0.0  ;;  %145 = vst.msk [vmem:[#allocation8 + $0x18] sm:$0xff] %vm53_vm0, %v358_v4  ;;  %s150_s27 = sshll.u32 %s314_s3, 4  ;;  %s315_s4 = smov 64   ;;  %s151_s27 = int_to_ptr.vmem [resolvable:$true] %s150_s27 }
  0x11   :  { %61 = vadd.xlane.f32.xlu1 %v60_v6  ;;  %55 = vadd.xlane.f32.xlu0 %v54_v7  ;;  %143 = vst.msk [vmem:[#allocation8 + $0x8] sm:$0xff] %vm53_vm0, %v360_v5  ;;  %v63_v10 = vsel %vm53_vm0, %v52_v8, 0.0  ;;  %v57_v11 = vsel %vm53_vm0, %v50_v9, 0.0  ;;  %s316_s5 = smov 4  }
  0x12   :  { %171 = dma.vmem_to_hbm [thread:$0]  %s164_s1, 512, %s166_s26, [#allocation9], %s309_s20, %s309_s20, %s310_s21  }
  0x15   :  { %v195_v13 = vpop.eup %194 }
  0x16   :  { %v67_v14 = vmul.f32 32.0, %v195_v13  ;;  %vm71_vm1 = vweird.f32 %v195_v13 }
  0x18   :  { %v68_v15 = vsub.f32 1.0, %v67_v14 }
  0x19   :  { %64 = vadd.xlane.f32.xlu1 %v63_v10  ;;  %58 = vadd.xlane.f32.xlu0 %v57_v11 }
  0x1a   :  { %v69_v16 = vmul.f32 %v195_v13, %v68_v15 }
  0x1c   :  { %v70_v17 = vadd.f32 %v195_v13, %v69_v16 }
  0x1e   :  { %v72_v18 = vsel %vm71_vm1, %v195_v13, %v70_v17 }
  0x84   :  { %v62_v19 = vpop.xlane.xlu1 %61  ;;  %v56_v20 = vpop.xlane.xlu0 %55 }
  0x85   :  { %v75_v21 = vmul.f32 %v72_v18, %v62_v19  ;;  %v73_v22 = vmul.f32 %v72_v18, %v56_v20 }
  0x87   :  { %v79_v23 = vadd.f32 1e-05, %v75_v21  ;;  %v77_v24 = vadd.f32 1e-05, %v73_v22 }
  0x89   :  { %196 = vrsqrt.f32 %v79_v23  ;;  %vm107_vm4 = vweird.f32 %v79_v23  ;;  %vm87_vm6 = vweird.f32 %v77_v24 }
  0x8a   :  { %198 = vrsqrt.f32 %v77_v24 }
  0x8c   :  { %v65_v25 = vpop.xlane.xlu1 %64  ;;  %v59_v26 = vpop.xlane.xlu0 %58 }
  0x8d   :  { %v76_v27 = vmul.f32 %v72_v18, %v65_v25  ;;  %v74_v28 = vmul.f32 %v72_v18, %v59_v26 }
  0x8f   :  { %v197_v29 = vpop.eup %196  ;;  %v80_v30 = vadd.f32 1e-05, %v76_v27  ;;  %v78_v31 = vadd.f32 1e-05, %v74_v28 }
  0x90   :  { %v199_v32 = vpop.eup %198  ;;  %v102_v33 = vmul.f32 %v197_v29, %v79_v23  ;;  %vm108_vm2 = vweird.f32 %v197_v29 }
  0x91   :  { %v82_v34 = vmul.f32 %v199_v32, %v77_v24  ;;  %200 = vrsqrt.f32 %v80_v30  ;;  %vm88_vm3 = vweird.f32 %v199_v32  ;;  %vm109_vm5 = vmor %vm107_vm4, %vm108_vm2  ;;  %vm117_vm11 = vweird.f32 %v80_v30 }
  0x92   :  { %v103_v35 = vmul.f32 %v197_v29, %v102_v33  ;;  %202 = vrsqrt.f32 %v78_v31  ;;  %vm89_vm7 = vmor %vm87_vm6, %vm88_vm3  ;;  %vm97_vm13 = vweird.f32 %v78_v31 }
  0x93   :  { %v83_v36 = vmul.f32 %v199_v32, %v82_v34 }
  0x94   :  { %v104_v37 = vmul.f32 0.5, %v103_v35 }
  0x95   :  { %v84_v38 = vmul.f32 0.5, %v83_v36 }
  0x96   :  { %v105_v39 = vsub.f32 1.5, %v104_v37 }
  0x97   :  { %v201_v40 = vpop.eup %200  ;;  %v85_v41 = vsub.f32 1.5, %v84_v38 }
  0x98   :  { %v203_v42 = vpop.eup %202  ;;  %v106_v43 = vmul.f32 %v197_v29, %v105_v39  ;;  %v112_v44 = vmul.f32 %v201_v40, %v80_v30  ;;  %vm118_vm9 = vweird.f32 %v201_v40 }
  0x99   :  { %v86_v46 = vmul.f32 %v199_v32, %v85_v41  ;;  %v92_v47 = vmul.f32 %v203_v42, %v78_v31  ;;  %vm98_vm10 = vweird.f32 %v203_v42  ;;  %vm119_vm12 = vmor %vm117_vm11, %vm118_vm9 }
  0x9a   :  { %v110_v48 = vsel %vm109_vm5, %v197_v29, %v106_v43  ;;  %v113_v49 = vmul.f32 %v201_v40, %v112_v44  ;;  %vm99_vm14 = vmor %vm97_vm13, %vm98_vm10 }
  0x9b   :  { %v123_v50 = vmul.f32 %v110_v48, %v346_v0  ;;  %v90_v51 = vsel %vm89_vm7, %v199_v32, %v86_v46  ;;  %v93_v52 = vmul.f32 %v203_v42, %v92_v47 }
  0x9c   :  { %v121_v53 = vmul.f32 %v90_v51, %v348_v1  ;;  %v114_v54 = vmul.f32 0.5, %v113_v49 }
  0x9d   :  { %v131_v55 = vmul.f32 %v193_v45, %v123_v50  ;;  %v94_v56 = vmul.f32 0.5, %v93_v52 }
  0x9e   :  { %v129_v57 = vmul.f32 %v193_v45, %v121_v53  ;;  %v115_v58 = vsub.f32 1.5, %v114_v54 }
  0x9f   :  { %v135_v59 = vpack.c.bf16 %v131_v55, %v131_v55  ;;  %v95_v60 = vsub.f32 1.5, %v94_v56 }
  0xa0   :  { %v133_v61 = vpack.c.bf16 %v129_v57, %v129_v57  ;;  %v116_v62 = vmul.f32 %v201_v40, %v115_v58 }
  0xa1   :  { %140 = vst.msk [vmem:[#allocation7 + $0x8] sm:$0xf] %vm137_vm8, %v135_v59  ;;  %v96_v63 = vmul.f32 %v203_v42, %v95_v60 }
  0xa2   :  { %138 = vst.msk [vmem:[#allocation7] sm:$0xf] %vm137_vm8, %v133_v61  ;;  %v120_v0 = vsel %vm119_vm12, %v201_v40, %v116_v62 }
  0xa3   :  { %v124_v1 = vmul.f32 %v120_v0, %v358_v4  ;;  %v100_v2 = vsel %vm99_vm14, %v203_v42, %v96_v63 }
  0xa4   :  { %v122_v3 = vmul.f32 %v100_v2, %v360_v5 }
  0xa5   :  { %v132_v6 = vmul.f32 %v193_v45, %v124_v1 }
  0xa6   :  { %v130_v7 = vmul.f32 %v193_v45, %v122_v3 }
  0xa7   :  { %v136_v8 = vpack.c.bf16 %v132_v6, %v132_v6 }
  0xa8   :  { %v134_v9 = vpack.c.bf16 %v130_v7, %v130_v7 }
  0xa9   :  { %141 = vst.msk [vmem:[#allocation7 + $0xc] sm:$0xf] %vm137_vm8, %v136_v8 }
  0xaa   :  { %139 = vst.msk [vmem:[#allocation7 + $0x4] sm:$0xf] %vm137_vm8, %v134_v9 }
  0xab   :  { %158 = dma.vmem_to_hbm [thread:$0]  %s151_s27, 256, %s153_s30, [#allocation4], %s315_s4, %s315_s4, %s316_s5  }
  0xac   :  { %304 = dma.done.wait [#allocation4], 256  }
  0xad   :  { %305 = vsyncadd [#allocation4], 4294967040 }
  0xae   :  { %306 = dma.done.wait [#allocation9], 512  }
  0xaf   :  { %307 = vsyncadd [#allocation9], 4294966784 }
  0xb0   :  { %180 = vsyncpa [#allocation3], 1 }
  0xb1   :  { %181 = vsyncpa [#allocation6], 1 }
  0xb2   :  { %182 = vsyncpa [#allocation4], 1 }
  0xb3   :  { %183 = vsyncpa [#allocation9], 1 }

</bundles_post_ra>
